<compile_context>
chip_gen: v5e
topology: v5e:2x2
jax: 0.10.0
libtpu: 0.0.40
codegen_flags: <defaults>
</compile_context>

<pallas_src>
import functools

import jax
import jax.numpy as jnp
import numpy as np
from jax import lax
from jax.experimental import pallas as pl
from jax.experimental.pallas import tpu as pltpu


def attention_kernel(n_valid_pixels, a_chunk,
                     enc_ref, dec_ref,
                     w_enc_ref, w_dec_ref,
                     b_att_ref, w_full_ref, b_full_ref,
                     awe_ref, alpha_ref):
    # enc_ref    : (TB, P_pad, E)  bf16 batch-chunk of encoder features (VMEM)
    # dec_ref    : (TB, D)         bf16 batch-chunk of decoder hidden   (VMEM)
    # w_enc_ref  : (E, A) bf16,  w_dec_ref : (D, A) bf16
    # b_att_ref  : (1, A) f32    (b_enc + b_dec folded)
    # w_full_ref : (1, A) f32    score projection as a lane-dense row
    # b_full_ref : (1,)   f32    scalar bias in SMEM
    # awe_ref    : (TB, E)     f32 attention-weighted encoding
    # alpha_ref  : (TB, P_pad) f32 attention weights (P on the lane axis)
    TB, P_pad, E = enc_ref.shape
    A = w_enc_ref.shape[1]

    enc = enc_ref[...]                                   # (TB, P_pad, E) bf16
    dec = dec_ref[...]                                   # (TB, D)        bf16
    # P_pad is a multiple of 16 (bf16 sublane pack), so this reshape is a
    # layout-preserving view (no VMEM relayout copy).
    enc2d = enc.reshape(TB * P_pad, E)

    # Score accumulator, seeded with the scalar full_att bias (SMEM).
    s = jnp.full((TB, P_pad), b_full_ref[0], dtype=jnp.float32)

    # A-chunked score accumulation: relu + weighted-sum are elementwise in A,
    # so this is exact while keeping the (TB, P_pad, Ac) intermediate small.
    for c0 in range(0, A, a_chunk):
        ac = min(a_chunk, A - c0)
        w_enc_c = w_enc_ref[:, c0:c0 + ac]               # (E, ac) bf16
        w_dec_c = w_dec_ref[:, c0:c0 + ac]               # (D, ac) bf16
        b_c = b_att_ref[:, c0:c0 + ac]                   # (1, ac) f32
        w_full_c = w_full_ref[:, c0:c0 + ac]             # (1, ac) f32

        # att1 = encoder_att(encoder_out): one (TB*P_pad, E) @ (E, ac) MXU
        # matmul, bf16 operands, f32 accumulation.
        att1 = jnp.dot(enc2d, w_enc_c,
                       preferred_element_type=jnp.float32)
        att1 = att1.reshape(TB, P_pad, ac)               # view (P_pad % 8 == 0)

        # att2 = decoder_att(decoder_hidden): (TB, D) @ (D, ac).
        att2 = jnp.dot(dec, w_dec_c,
                       preferred_element_type=jnp.float32)       # (TB, ac)

        # relu(att1 + att2.unsqueeze(1) + fused bias), all f32.
        h = jnp.maximum(att1 + att2[:, None, :] + b_c, 0.0)      # (TB, P_pad, ac)

        # full_att(.) chunk contribution: VPU multiply + lane reduce
        # (no N=1 MXU matmul).
        s = s + jnp.sum(h * w_full_c, axis=-1)                   # (TB, P_pad)

    # Mask padded pixels out of the softmax (only traced when P was padded).
    if n_valid_pixels < P_pad:
        pix = lax.broadcasted_iota(jnp.int32, (TB, P_pad), 1)
        s = jnp.where(pix < n_valid_pixels, s, jnp.float32(-1e30))

    # Numerically-stable softmax over the pixel axis, lane-dense.
    m = jnp.max(s, axis=-1, keepdims=True)               # (TB, 1)
    e = jnp.exp(s - m)                                   # (TB, P_pad)
    denom = jnp.sum(e, axis=-1, keepdims=True)           # (TB, 1)
    alpha = e * pl.reciprocal(denom, approx=True)        # EUP slot, ~free

    # attention_weighted_encoding = sum_p alpha_p * enc_p : VPU mul (promotes
    # bf16*f32 -> f32) + XLU sublane reduction over P (E stays lane-dense).
    awe = jnp.sum(enc * alpha[:, :, None], axis=1)       # (TB, E) f32

    awe_ref[...] = awe.astype(awe_ref.dtype)
    alpha_ref[...] = alpha


def _vmem_capacity_bytes():
    try:
        return int(pltpu.get_tpu_info().vmem_capacity_bytes)
    except Exception:
        return 64 * 1024 * 1024   # conservative default: v7x per-TensorCore VMEM


def _block_vmem_bytes(tb, p_pad, e, d, a, ac):
    """Rough per-grid-step VMEM footprint for a given batch tile / A chunk."""
    enc_blk = tb * p_pad * e * 2            # bf16 encoder chunk
    dec_blk = tb * d * 2                    # bf16 decoder chunk
    out_awe = tb * e * 4
    out_alpha = tb * p_pad * 4
    io = 2 * (enc_blk + dec_blk + out_awe + out_alpha)   # double-buffered I/O
    inter = 3 * tb * p_pad * ac * 4         # att1 / h / h*w_full (f32, per chunk)
    awe_prod = tb * p_pad * e * 4           # alpha-weighted enc product (f32)
    score = tb * p_pad * 4
    return io + inter + awe_prod + score


def _choose_tiling(b, p_pad, e, d, a, budget):
    """VMEM-aware (tb, a_chunk) selection; keeps >=2 grid steps when B >= 16."""
    weight_bytes = (e + d) * a * 2 + 2 * a * 4   # bf16 weights + f32 bias / w_full
    tbs = sorted({x for x in range(1, b + 1) if b % x == 0}, reverse=True)
    if b >= 16:
        # >= 2 grid steps so the "parallel" batch axis can shard across the two
        # v7x TensorCores (negligible cost on single-TC v5e/v6e).
        tbs = [x for x in tbs if x <= b // 2] or [1]
    acs = [a] if a <= 512 else [512, 256, 128]
    for ac in acs:
        for tb in tbs:
            if weight_bytes + _block_vmem_bytes(tb, p_pad, e, d, a, ac) <= budget:
                return tb, ac
    return tbs[-1], min(a, 128)   # last resort at extreme dims


def _build_attention_call(B, P, P_pad, E, D, A, tb, a_chunk, vmem_limit,
                          single_buffer_weights):
    kernel = functools.partial(attention_kernel, P, a_chunk)

    # Grid-invariant operands: single-buffer when supported (halves their VMEM).
    wkw = ({"pipeline_mode": pl.Buffered(1)} if single_buffer_weights else {})

    def const_spec(shape):
        return pl.BlockSpec(shape, lambda b: (0,) * len(shape), **wkw)

    grid_spec = pltpu.PrefetchScalarGridSpec(
        num_scalar_prefetch=0,
        grid=(B // tb,),
        in_specs=[
            pl.BlockSpec((tb, P_pad, E), lambda b: (b, 0, 0)),     # encoder_out
            pl.BlockSpec((tb, D), lambda b: (b, 0)),               # decoder_hidden
            const_spec((E, A)),                                    # W_enc^T (bf16)
            const_spec((D, A)),                                    # W_dec^T (bf16)
            const_spec((1, A)),                                    # b_enc + b_dec
            const_spec((1, A)),                                    # W_full^T row
            pl.BlockSpec(memory_space=pltpu.MemorySpace.SMEM),     # b_full scalar
        ],
        out_specs=[
            pl.BlockSpec((tb, E), lambda b: (b, 0)),               # awe
            pl.BlockSpec((tb, P_pad), lambda b: (b, 0)),           # alpha
        ],
    )

    return pl.pallas_call(
        kernel,
        out_shape=(
            jax.ShapeDtypeStruct((B, E), jnp.float32),
            jax.ShapeDtypeStruct((B, P_pad), jnp.float32),
        ),
        grid_spec=grid_spec,
        compiler_params=pltpu.CompilerParams(
            dimension_semantics=("parallel",),
            vmem_limit_bytes=vmem_limit),
    )


def attention_forward(encoder_out, decoder_hidden, params, *, tb=None,
                      a_chunk=None):
    """encoder_out: (B, P, E) f32, decoder_hidden: (B, D) f32."""
    B, P, E = encoder_out.shape
    D = decoder_hidden.shape[1]
    A = params["w_enc"].shape[1]

    # Pad the pixel axis to the bf16 sublane pack (16) so the in-kernel
    # (TB,P,E) <-> (TB*P,E) reshape is a pure view (no VMEM relayout copy).
    P_pad = -(-P // 16) * 16
    if P_pad != P:
        encoder_out = jnp.pad(encoder_out, ((0, 0), (0, P_pad - P), (0, 0)))

    # bf16 operands for the MXU matmuls (also halves the dominant enc HBM DMA
    # and the enc VMEM block); accumulation and all other math stay f32.
    enc_bf = encoder_out.astype(jnp.bfloat16)
    dec_bf = decoder_hidden.astype(jnp.bfloat16)
    w_enc = params["w_enc"].astype(jnp.bfloat16)
    w_dec = params["w_dec"].astype(jnp.bfloat16)
    b_att = (params["b_enc"] + params["b_dec"]).reshape(1, A).astype(jnp.float32)
    w_full = params["w_full"].reshape(1, A).astype(jnp.float32)
    b_full = params["b_full"].reshape(1).astype(jnp.float32)

    # VMEM-aware tiling: budget blocks against the physical capacity and raise
    # the scoped VMEM limit accordingly (v5e default is only 16 MiB of 128).
    vmem_cap = _vmem_capacity_bytes()
    vmem_limit = max(int(vmem_cap * 0.85), 32 * 1024 * 1024)
    budget = int(vmem_cap * 0.55)
    tb_auto, ac_auto = _choose_tiling(B, P_pad, E, D, A, budget)
    tb = tb_auto if tb is None else tb
    a_chunk = ac_auto if a_chunk is None else a_chunk
    assert B % tb == 0, "batch tile must divide batch"

    args = (enc_bf, dec_bf, w_enc, w_dec, b_att, w_full, b_full)
    try:
        awe, alpha = _build_attention_call(
            B, P, P_pad, E, D, A, tb, a_chunk, vmem_limit, True)(*args)
    except Exception:
        # pipeline_mode=pl.Buffered(1) not supported by this pallas build;
        # identical kernel with default (double-buffered) weight operands.
        awe, alpha = _build_attention_call(
            B, P, P_pad, E, D, A, tb, a_chunk, vmem_limit, False)(*args)

    if P_pad != P:
        alpha = alpha[:, :P]
    return awe, alpha


def reference_forward(encoder_out, decoder_hidden, params):
    att1 = encoder_out @ params["w_enc"] + params["b_enc"]
    att2 = decoder_hidden @ params["w_dec"] + params["b_dec"]
    h = jnp.maximum(att1 + att2[:, None, :], 0.0)
    att = (h @ params["w_full"] + params["b_full"]).squeeze(2)
    alpha = jax.nn.softmax(att, axis=1)
    awe = (encoder_out * alpha[:, :, None]).sum(axis=1)
    return awe, alpha


if __name__ == "__main__":
    # Small shapes consistent with the module's forward.
    B, P = 2, 16          # batch, num_pixels
    E, D, A = 32, 32, 32  # encoder_dim, decoder_dim, attention_dim

    key = jax.random.PRNGKey(0)
    k_enc, k_dec, kwe, kbe, kwd, kbd, kwf, kbf = jax.random.split(key, 8)

    encoder_out = jax.random.normal(k_enc, (B, P, E), dtype=jnp.float32)
    decoder_hidden = jax.random.normal(k_dec, (B, D), dtype=jnp.float32)

    # Deterministic parameter init (shapes match nn.Linear; stored transposed).
    params = {
        "w_enc": 0.1 * jax.random.normal(kwe, (E, A), dtype=jnp.float32),
        "b_enc": 0.1 * jax.random.normal(kbe, (A,), dtype=jnp.float32),
        "w_dec": 0.1 * jax.random.normal(kwd, (D, A), dtype=jnp.float32),
        "b_dec": 0.1 * jax.random.normal(kbd, (A,), dtype=jnp.float32),
        "w_full": 0.1 * jax.random.normal(kwf, (A, 1), dtype=jnp.float32),
        "b_full": 0.1 * jax.random.normal(kbf, (1,), dtype=jnp.float32),
    }

    awe, alpha = attention_forward(encoder_out, decoder_hidden, params)
    jax.block_until_ready((awe, alpha))

    # bf16 MXU operands (f32 accumulation) -> loosened tolerance vs f32 ref.
    awe_ref, alpha_ref = reference_forward(encoder_out, decoder_hidden, params)
    np.testing.assert_allclose(np.asarray(awe), np.asarray(awe_ref),
                               rtol=2e-2, atol=2e-2)
    np.testing.assert_allclose(np.asarray(alpha), np.asarray(alpha_ref),
                               rtol=2e-2, atol=2e-2)

    print("KERNEL_OK")
</pallas_src>

<mosaic_0001>
module attributes {stable_mosaic.version = 11 : i64} {
  func.func @attention_kernel(%arg0: i32, %arg1: memref<2x16x32xbf16, #tpu.memory_space<vmem>>, %arg2: memref<2x32xbf16, #tpu.memory_space<vmem>>, %arg3: memref<32x32xbf16, #tpu.memory_space<vmem>>, %arg4: memref<32x32xbf16, #tpu.memory_space<vmem>>, %arg5: memref<1x32xf32, #tpu.memory_space<vmem>>, %arg6: memref<1x32xf32, #tpu.memory_space<vmem>>, %arg7: memref<1xf32, #tpu.memory_space<smem>>, %arg8: memref<2x32xf32, #tpu.memory_space<vmem>>, %arg9: memref<2x16xf32, #tpu.memory_space<vmem>>) attributes {dimension_semantics = [#tpu.dimension_semantics<parallel>], iteration_bounds = array<i64: 1>, scalar_prefetch = 0 : i64, scratch_operands = 0 : i64, tpu.core_type = #tpu.core_type<tc>, window_params = [{transform_indices = @transform_0, window_bounds = array<i64: 2, 16, 32>}, {transform_indices = @transform_1, window_bounds = array<i64: 2, 32>}, {pipeline_mode = #tpu.pipeline_mode<synchronous>, transform_indices = @transform_2, window_bounds = array<i64: 32, 32>}, {pipeline_mode = #tpu.pipeline_mode<synchronous>, transform_indices = @transform_3, window_bounds = array<i64: 32, 32>}, {pipeline_mode = #tpu.pipeline_mode<synchronous>, transform_indices = @transform_4, window_bounds = array<i64: 1, 32>}, {pipeline_mode = #tpu.pipeline_mode<synchronous>, transform_indices = @transform_5, window_bounds = array<i64: 1, 32>}, {transform_indices = @transform_6, window_bounds = array<i64: 1>}, {transform_indices = @transform_7, window_bounds = array<i64: 2, 32>}, {transform_indices = @transform_8, window_bounds = array<i64: 2, 16>}]} {
    %c0 = arith.constant 0 : index
    %c0_0 = arith.constant 0 : index
    %c0_1 = arith.constant 0 : index
    %0 = vector.load %arg1[%c0, %c0_0, %c0_1] : memref<2x16x32xbf16, #tpu.memory_space<vmem>>, vector<2x16x32xbf16>
    %c0_2 = arith.constant 0 : index
    %c0_3 = arith.constant 0 : index
    %1 = vector.load %arg2[%c0_2, %c0_3] : memref<2x32xbf16, #tpu.memory_space<vmem>>, vector<2x32xbf16>
    %2 = vector.shape_cast %0 : vector<2x16x32xbf16> to vector<32x32xbf16>
    %c0_4 = arith.constant 0 : index
    %3 = memref.load %arg7[%c0_4] : memref<1xf32, #tpu.memory_space<smem>>
    %4 = vector.broadcast %3 : f32 to vector<2x16xf32>
    %c0_5 = arith.constant 0 : index
    %c0_6 = arith.constant 0 : index
    %5 = vector.load %arg3[%c0_5, %c0_6] : memref<32x32xbf16, #tpu.memory_space<vmem>>, vector<32x32xbf16>
    %c0_7 = arith.constant 0 : index
    %c0_8 = arith.constant 0 : index
    %6 = vector.load %arg4[%c0_7, %c0_8] : memref<32x32xbf16, #tpu.memory_space<vmem>>, vector<32x32xbf16>
    %c0_9 = arith.constant 0 : index
    %c0_10 = arith.constant 0 : index
    %7 = vector.load %arg5[%c0_9, %c0_10] : memref<1x32xf32, #tpu.memory_space<vmem>>, vector<1x32xf32>
    %c0_11 = arith.constant 0 : index
    %c0_12 = arith.constant 0 : index
    %8 = vector.load %arg6[%c0_11, %c0_12] : memref<1x32xf32, #tpu.memory_space<vmem>>, vector<1x32xf32>
    %cst = arith.constant dense<0.000000e+00> : vector<32x32xf32>
    %9 = tpu.matmul %2, %5, %cst {dimension_numbers = #tpu.dot_dimension_numbers<[1], [0], [0], [1], [0, 0, 1, 1], [], []>} : vector<32x32xbf16>, vector<32x32xbf16>, vector<32x32xf32> -> vector<32x32xf32>
    %10 = vector.shape_cast %9 : vector<32x32xf32> to vector<2x16x32xf32>
    %cst_13 = arith.constant dense<0.000000e+00> : vector<2x32xf32>
    %11 = tpu.matmul %1, %6, %cst_13 {dimension_numbers = #tpu.dot_dimension_numbers<[1], [0], [0], [1], [0, 0, 1, 1], [], []>} : vector<2x32xbf16>, vector<32x32xbf16>, vector<2x32xf32> -> vector<2x32xf32>
    %12 = vector.shape_cast %11 : vector<2x32xf32> to vector<2x1x32xf32>
    %13 = vector.broadcast %12 : vector<2x1x32xf32> to vector<2x16x32xf32>
    %14 = arith.addf %10, %13 : vector<2x16x32xf32>
    %15 = vector.shape_cast %7 : vector<1x32xf32> to vector<1x1x32xf32>
    %16 = vector.broadcast %15 : vector<1x1x32xf32> to vector<2x16x32xf32>
    %17 = arith.addf %14, %16 : vector<2x16x32xf32>
    %cst_14 = arith.constant 0.000000e+00 : f32
    %18 = vector.broadcast %cst_14 : f32 to vector<2x16x32xf32>
    %19 = arith.maximumf %17, %18 : vector<2x16x32xf32>
    %20 = vector.shape_cast %8 : vector<1x32xf32> to vector<1x1x32xf32>
    %21 = vector.broadcast %20 : vector<1x1x32xf32> to vector<2x16x32xf32>
    %22 = arith.mulf %19, %21 : vector<2x16x32xf32>
    %cst_15 = arith.constant dense<0.000000e+00> : vector<2x16xf32>
    %23 = vector.multi_reduction <add>, %22, %cst_15 [2] : vector<2x16x32xf32> to vector<2x16xf32>
    %24 = arith.addf %4, %23 : vector<2x16xf32>
    %cst_16 = arith.constant dense<0xFF800000> : vector<2xf32>
    %25 = vector.multi_reduction <maximumf>, %24, %cst_16 [1] : vector<2x16xf32> to vector<2xf32>
    %26 = vector.shape_cast %25 : vector<2xf32> to vector<2x1xf32>
    %27 = vector.broadcast %26 : vector<2x1xf32> to vector<2x16xf32>
    %28 = arith.subf %24, %27 : vector<2x16xf32>
    %29 = math.exp %28 : vector<2x16xf32>
    %cst_17 = arith.constant dense<0.000000e+00> : vector<2xf32>
    %30 = vector.multi_reduction <add>, %29, %cst_17 [1] : vector<2x16xf32> to vector<2xf32>
    %31 = vector.shape_cast %30 : vector<2xf32> to vector<2x1xf32>
    %32 = tpu.reciprocal %31 {approx = true} : vector<2x1xf32> -> vector<2x1xf32>
    %33 = vector.broadcast %32 : vector<2x1xf32> to vector<2x16xf32>
    %34 = arith.mulf %29, %33 : vector<2x16xf32>
    %35 = vector.shape_cast %34 : vector<2x16xf32> to vector<2x16x1xf32>
    %36 = arith.extf %0 : vector<2x16x32xbf16> to vector<2x16x32xf32>
    %37 = vector.broadcast %35 : vector<2x16x1xf32> to vector<2x16x32xf32>
    %38 = arith.mulf %36, %37 : vector<2x16x32xf32>
    %cst_18 = arith.constant dense<0.000000e+00> : vector<2x32xf32>
    %39 = vector.multi_reduction <add>, %38, %cst_18 [1] : vector<2x16x32xf32> to vector<2x32xf32>
    %c0_19 = arith.constant 0 : index
    %c0_20 = arith.constant 0 : index
    %40 = vector.load %arg8[%c0_19, %c0_20] : memref<2x32xf32, #tpu.memory_space<vmem>>, vector<2x32xf32>
    tpu.vector_store %arg8[%c0_19, %c0_20], %39 {strides = array<i32>} : memref<2x32xf32, #tpu.memory_space<vmem>>, vector<2x32xf32>,
    %c0_21 = arith.constant 0 : index
    %c0_22 = arith.constant 0 : index
    %41 = vector.load %arg9[%c0_21, %c0_22] : memref<2x16xf32, #tpu.memory_space<vmem>>, vector<2x16xf32>
    tpu.vector_store %arg9[%c0_21, %c0_22], %34 {strides = array<i32>} : memref<2x16xf32, #tpu.memory_space<vmem>>, vector<2x16xf32>,
    return
  }
  func.func @transform_0(%arg0: i32) -> (i32, i32, i32) {
    %c0_i32 = arith.constant 0 : i32
    %c0_i32_0 = arith.constant 0 : i32
    %c0_i32_1 = arith.constant 0 : i32
    return %arg0, %c0_i32, %c0_i32_0 : i32, i32, i32
  }
  func.func @transform_1(%arg0: i32) -> (i32, i32) {
    %c0_i32 = arith.constant 0 : i32
    %c0_i32_0 = arith.constant 0 : i32
    return %arg0, %c0_i32 : i32, i32
  }
  func.func @transform_2(%arg0: i32) -> (i32, i32) {
    %c0_i32 = arith.constant 0 : i32
    %c0_i32_0 = arith.constant 0 : i32
    %c0_i32_1 = arith.constant 0 : i32
    return %c0_i32, %c0_i32_0 : i32, i32
  }
  func.func @transform_3(%arg0: i32) -> (i32, i32) {
    %c0_i32 = arith.constant 0 : i32
    %c0_i32_0 = arith.constant 0 : i32
    %c0_i32_1 = arith.constant 0 : i32
    return %c0_i32, %c0_i32_0 : i32, i32
  }
  func.func @transform_4(%arg0: i32) -> (i32, i32) {
    %c0_i32 = arith.constant 0 : i32
    %c0_i32_0 = arith.constant 0 : i32
    %c0_i32_1 = arith.constant 0 : i32
    return %c0_i32, %c0_i32_0 : i32, i32
  }
  func.func @transform_5(%arg0: i32) -> (i32, i32) {
    %c0_i32 = arith.constant 0 : i32
    %c0_i32_0 = arith.constant 0 : i32
    %c0_i32_1 = arith.constant 0 : i32
    return %c0_i32, %c0_i32_0 : i32, i32
  }
  func.func @transform_6(%arg0: i32) -> i32 {
    %c0_i32 = arith.constant 0 : i32
    %c0_i32_0 = arith.constant 0 : i32
    return %c0_i32 : i32
  }
  func.func @transform_7(%arg0: i32) -> (i32, i32) {
    %c0_i32 = arith.constant 0 : i32
    %c0_i32_0 = arith.constant 0 : i32
    return %arg0, %c0_i32 : i32, i32
  }
  func.func @transform_8(%arg0: i32) -> (i32, i32) {
    %c0_i32 = arith.constant 0 : i32
    %c0_i32_0 = arith.constant 0 : i32
    return %arg0, %c0_i32 : i32, i32
  }
}

module attributes {stable_mosaic.version = 11 : i64} {
  func.func @attention_kernel(%arg0: i32, %arg1: memref<2x16x32xbf16, #tpu.memory_space<vmem>>, %arg2: memref<2x32xbf16, #tpu.memory_space<vmem>>, %arg3: memref<32x32xbf16, #tpu.memory_space<vmem>>, %arg4: memref<32x32xbf16, #tpu.memory_space<vmem>>, %arg5: memref<1x32xf32, #tpu.memory_space<vmem>>, %arg6: memref<1x32xf32, #tpu.memory_space<vmem>>, %arg7: memref<1xf32, #tpu.memory_space<smem>>, %arg8: memref<2x32xf32, #tpu.memory_space<vmem>>, %arg9: memref<2x16xf32, #tpu.memory_space<vmem>>) attributes {dimension_semantics = [#tpu.dimension_semantics<parallel>], iteration_bounds = array<i64: 1>, scalar_prefetch = 0 : i64, scratch_operands = 0 : i64, tpu.core_type = #tpu.core_type<tc>, window_params = [{transform_indices = @transform_0, window_bounds = array<i64: 2, 16, 32>}, {transform_indices = @transform_1, window_bounds = array<i64: 2, 32>}, {pipeline_mode = #tpu.pipeline_mode<synchronous>, transform_indices = @transform_2, window_bounds = array<i64: 32, 32>}, {pipeline_mode = #tpu.pipeline_mode<synchronous>, transform_indices = @transform_3, window_bounds = array<i64: 32, 32>}, {pipeline_mode = #tpu.pipeline_mode<synchronous>, transform_indices = @transform_4, window_bounds = array<i64: 1, 32>}, {pipeline_mode = #tpu.pipeline_mode<synchronous>, transform_indices = @transform_5, window_bounds = array<i64: 1, 32>}, {transform_indices = @transform_6, window_bounds = array<i64: 1>}, {transform_indices = @transform_7, window_bounds = array<i64: 2, 32>}, {transform_indices = @transform_8, window_bounds = array<i64: 2, 16>}]} {
    %c0 = arith.constant 0 : index
    %c0_0 = arith.constant 0 : index
    %c0_1 = arith.constant 0 : index
    %0 = vector.load %arg1[%c0, %c0_0, %c0_1] : memref<2x16x32xbf16, #tpu.memory_space<vmem>>, vector<2x16x32xbf16>
    %c0_2 = arith.constant 0 : index
    %c0_3 = arith.constant 0 : index
    %1 = vector.load %arg2[%c0_2, %c0_3] : memref<2x32xbf16, #tpu.memory_space<vmem>>, vector<2x32xbf16>
    %2 = vector.shape_cast %0 : vector<2x16x32xbf16> to vector<32x32xbf16>
    %c0_4 = arith.constant 0 : index
    %3 = memref.load %arg7[%c0_4] : memref<1xf32, #tpu.memory_space<smem>>
    %4 = vector.broadcast %3 : f32 to vector<2x16xf32>
    %c0_5 = arith.constant 0 : index
    %c0_6 = arith.constant 0 : index
    %5 = vector.load %arg3[%c0_5, %c0_6] : memref<32x32xbf16, #tpu.memory_space<vmem>>, vector<32x32xbf16>
    %c0_7 = arith.constant 0 : index
    %c0_8 = arith.constant 0 : index
    %6 = vector.load %arg4[%c0_7, %c0_8] : memref<32x32xbf16, #tpu.memory_space<vmem>>, vector<32x32xbf16>
    %c0_9 = arith.constant 0 : index
    %c0_10 = arith.constant 0 : index
    %7 = vector.load %arg5[%c0_9, %c0_10] : memref<1x32xf32, #tpu.memory_space<vmem>>, vector<1x32xf32>
    %c0_11 = arith.constant 0 : index
    %c0_12 = arith.constant 0 : index
    %8 = vector.load %arg6[%c0_11, %c0_12] : memref<1x32xf32, #tpu.memory_space<vmem>>, vector<1x32xf32>
    %cst = arith.constant dense<0.000000e+00> : vector<32x32xf32>
    %9 = tpu.matmul %2, %5, %cst {dimension_numbers = #tpu.dot_dimension_numbers<[1], [0], [0], [1], [0, 0, 1, 1], [], []>} : vector<32x32xbf16>, vector<32x32xbf16>, vector<32x32xf32> -> vector<32x32xf32>
    %10 = vector.shape_cast %9 : vector<32x32xf32> to vector<2x16x32xf32>
    %cst_13 = arith.constant dense<0.000000e+00> : vector<2x32xf32>
    %11 = tpu.matmul %1, %6, %cst_13 {dimension_numbers = #tpu.dot_dimension_numbers<[1], [0], [0], [1], [0, 0, 1, 1], [], []>} : vector<2x32xbf16>, vector<32x32xbf16>, vector<2x32xf32> -> vector<2x32xf32>
    %12 = vector.shape_cast %11 : vector<2x32xf32> to vector<2x1x32xf32>
    %13 = vector.broadcast %12 : vector<2x1x32xf32> to vector<2x16x32xf32>
    %14 = arith.addf %10, %13 : vector<2x16x32xf32>
    %15 = vector.shape_cast %7 : vector<1x32xf32> to vector<1x1x32xf32>
    %16 = vector.broadcast %15 : vector<1x1x32xf32> to vector<2x16x32xf32>
    %17 = arith.addf %14, %16 : vector<2x16x32xf32>
    %cst_14 = arith.constant 0.000000e+00 : f32
    %18 = vector.broadcast %cst_14 : f32 to vector<2x16x32xf32>
    %19 = arith.maximumf %17, %18 : vector<2x16x32xf32>
    %20 = vector.shape_cast %8 : vector<1x32xf32> to vector<1x1x32xf32>
    %21 = vector.broadcast %20 : vector<1x1x32xf32> to vector<2x16x32xf32>
    %22 = arith.mulf %19, %21 : vector<2x16x32xf32>
    %cst_15 = arith.constant dense<0.000000e+00> : vector<2x16xf32>
    %23 = vector.multi_reduction <add>, %22, %cst_15 [2] : vector<2x16x32xf32> to vector<2x16xf32>
    %24 = arith.addf %4, %23 : vector<2x16xf32>
    %cst_16 = arith.constant dense<0xFF800000> : vector<2xf32>
    %25 = vector.multi_reduction <maximumf>, %24, %cst_16 [1] : vector<2x16xf32> to vector<2xf32>
    %26 = vector.shape_cast %25 : vector<2xf32> to vector<2x1xf32>
    %27 = vector.broadcast %26 : vector<2x1xf32> to vector<2x16xf32>
    %28 = arith.subf %24, %27 : vector<2x16xf32>
    %29 = math.exp %28 : vector<2x16xf32>
    %cst_17 = arith.constant dense<0.000000e+00> : vector<2xf32>
    %30 = vector.multi_reduction <add>, %29, %cst_17 [1] : vector<2x16xf32> to vector<2xf32>
    %31 = vector.shape_cast %30 : vector<2xf32> to vector<2x1xf32>
    %32 = tpu.reciprocal %31 {approx = true} : vector<2x1xf32> -> vector<2x1xf32>
    %33 = vector.broadcast %32 : vector<2x1xf32> to vector<2x16xf32>
    %34 = arith.mulf %29, %33 : vector<2x16xf32>
    %35 = vector.shape_cast %34 : vector<2x16xf32> to vector<2x16x1xf32>
    %36 = arith.extf %0 : vector<2x16x32xbf16> to vector<2x16x32xf32>
    %37 = vector.broadcast %35 : vector<2x16x1xf32> to vector<2x16x32xf32>
    %38 = arith.mulf %36, %37 : vector<2x16x32xf32>
    %cst_18 = arith.constant dense<0.000000e+00> : vector<2x32xf32>
    %39 = vector.multi_reduction <add>, %38, %cst_18 [1] : vector<2x16x32xf32> to vector<2x32xf32>
    %c0_19 = arith.constant 0 : index
    %c0_20 = arith.constant 0 : index
    %40 = vector.load %arg8[%c0_19, %c0_20] : memref<2x32xf32, #tpu.memory_space<vmem>>, vector<2x32xf32>
    tpu.vector_store %arg8[%c0_19, %c0_20], %39 {strides = array<i32>} : memref<2x32xf32, #tpu.memory_space<vmem>>, vector<2x32xf32>,
    %c0_21 = arith.constant 0 : index
    %c0_22 = arith.constant 0 : index
    %41 = vector.load %arg9[%c0_21, %c0_22] : memref<2x16xf32, #tpu.memory_space<vmem>>, vector<2x16xf32>
    tpu.vector_store %arg9[%c0_21, %c0_22], %34 {strides = array<i32>} : memref<2x16xf32, #tpu.memory_space<vmem>>, vector<2x16xf32>,
    return
  }
  func.func @transform_0(%arg0: i32) -> (i32, i32, i32) {
    %c0_i32 = arith.constant 0 : i32
    %c0_i32_0 = arith.constant 0 : i32
    %c0_i32_1 = arith.constant 0 : i32
    return %arg0, %c0_i32, %c0_i32_0 : i32, i32, i32
  }
  func.func @transform_1(%arg0: i32) -> (i32, i32) {
    %c0_i32 = arith.constant 0 : i32
    %c0_i32_0 = arith.constant 0 : i32
    return %arg0, %c0_i32 : i32, i32
  }
  func.func @transform_2(%arg0: i32) -> (i32, i32) {
    %c0_i32 = arith.constant 0 : i32
    %c0_i32_0 = arith.constant 0 : i32
    %c0_i32_1 = arith.constant 0 : i32
    return %c0_i32, %c0_i32_0 : i32, i32
  }
  func.func @transform_3(%arg0: i32) -> (i32, i32) {
    %c0_i32 = arith.constant 0 : i32
    %c0_i32_0 = arith.constant 0 : i32
    %c0_i32_1 = arith.constant 0 : i32
    return %c0_i32, %c0_i32_0 : i32, i32
  }
  func.func @transform_4(%arg0: i32) -> (i32, i32) {
    %c0_i32 = arith.constant 0 : i32
    %c0_i32_0 = arith.constant 0 : i32
    %c0_i32_1 = arith.constant 0 : i32
    return %c0_i32, %c0_i32_0 : i32, i32
  }
  func.func @transform_5(%arg0: i32) -> (i32, i32) {
    %c0_i32 = arith.constant 0 : i32
    %c0_i32_0 = arith.constant 0 : i32
    %c0_i32_1 = arith.constant 0 : i32
    return %c0_i32, %c0_i32_0 : i32, i32
  }
  func.func @transform_6(%arg0: i32) -> i32 {
    %c0_i32 = arith.constant 0 : i32
    %c0_i32_0 = arith.constant 0 : i32
    return %c0_i32 : i32
  }
  func.func @transform_7(%arg0: i32) -> (i32, i32) {
    %c0_i32 = arith.constant 0 : i32
    %c0_i32_0 = arith.constant 0 : i32
    return %arg0, %c0_i32 : i32, i32
  }
  func.func @transform_8(%arg0: i32) -> (i32, i32) {
    %c0_i32 = arith.constant 0 : i32
    %c0_i32_0 = arith.constant 0 : i32
    return %arg0, %c0_i32 : i32, i32
  }
}

</mosaic_0001>

<bundles_post_ra>
// kernel: tpu_custom_call.1
= control target key start
LH: loop header
LB: loop body
LE: loop exit
PB: predicated region body
PF: predicated region fallthrough
CT: control target
= control target key end

     0   :  { %15 = vsyncpa [#allocation4], 0  ;;  %s693_s0 = inlined_call_operand.hbm [shape: bf16[2,16,32], index: 0, kind: input, shape index: {}]   ;;  %s694_s1 = inlined_call_operand.vmem [shape: bf16[2,32], index: 1, kind: input, shape index: {}]   ;;  %s695_s2 = inlined_call_operand.hbm [shape: bf16[32,32], index: 2, kind: input, shape index: {}]   ;;  %s696_s3 = inlined_call_operand.hbm [shape: bf16[32,32], index: 3, kind: input, shape index: {}]   ;;  %s697_s4 = inlined_call_operand.vmem [shape: f32[1,32], index: 4, kind: input, shape index: {}]   ;;  %s698_s5 = inlined_call_operand.vmem [shape: f32[1,32], index: 5, kind: input, shape index: {}]   ;;  %s699_s6 = inlined_call_operand.<no memory space> [shape: f32[1], index: 6, kind: input, shape index: {}]   ;;  %s700_s7 = inlined_call_operand.hbm [shape: f32[2,32], index: 7, kind: output, shape index: {0}]   ;;  %s701_s8 = inlined_call_operand.hbm [shape: f32[2,16], index: 8, kind: output, shape index: {1}]  }
   0x1   :  { %16 = vsyncpa [#allocation7], 0 }
   0x2   :  { %17 = vsyncpa [#allocation5], 0 }
   0x3   :  { %18 = vsyncpa [#allocation11], 0  ;;  %s38_s29 = sshll.u32 %s695_s2, 4  ;;  %s572_s30 = smov [#allocation6]   ;;  %s39_s29 = int_to_ptr.hbm [resolvable:$true] %s38_s29 }
   0x4   :  { %s40_s9 = sshll.u32 %s572_s30, 4  ;;  %s23_s12 = sshll.u32 %s693_s0, 4  ;;  %s41_s9 = int_to_ptr.vmem [resolvable:$true] %s40_s9  ;;  %s24_s12 = int_to_ptr.hbm [resolvable:$true] %s23_s12 }
   0x5   :  { %s573_s13 = smov 64   ;;  %s574_s14 = smov 4  }
   0x6   :  { %46 = dma.hbm_to_vmem [thread:$0]  %s39_s29, 256, %s41_s9, [#allocation7], %s573_s13, %s573_s13, %s574_s14  }
   0x7   :  { %s575_s15 = smov [#allocation3]   ;;  %s51_s19 = sshll.u32 %s696_s3, 4  ;;  %s52_s19 = int_to_ptr.hbm [resolvable:$true] %s51_s19 }
   0x8   :  { %s25_s16 = sshll.u32 %s575_s15, 4  ;;  %s576_s2 = smov [#allocation8]   ;;  %s26_s16 = int_to_ptr.vmem [resolvable:$true] %s25_s16 }
   0x9   :  { %31 = dma.hbm_to_vmem [thread:$0]  %s24_s12, 256, %s26_s16, [#allocation4], %s573_s13, %s573_s13, %s574_s14  }
   0xa   :  { %s53_s20 = sshll.u32 %s576_s2, 4  ;;  %s54_s20 = int_to_ptr.vmem [resolvable:$true] %s53_s20 }
   0xb   :  { %59 = dma.hbm_to_vmem [thread:$0]  %s52_s19, 256, %s54_s20, [#allocation7], %s573_s13, %s573_s13, %s574_s14  }
   0xc   :  { %564 = dma.done.wait [#allocation4], 256  }
   0xd   :  { %565 = vsyncadd [#allocation4], 4294967040 }
   0xe   :  { %566 = dma.done.wait [#allocation7], 512  }
   0xf   :  { %567 = vsyncadd [#allocation7], 4294966784  ;;  %v416_v0 = vld [vmem:[#allocation6 + $0x8] sm:$0xff]  ;;  %v418_v1 = vld [vmem:[#allocation8 + $0x8] sm:$0xff]  ;;  %vm118_vm0 = vcmask 261120   ;;  %v220_v39 = vlaneseq  ;;  %v85_v42 = vstv %s699_s6  ;;  %vm225_vm1 = vcmask 130112  }
  0x10   :  { %131 = vmatpush.bf16.msra.mxu0 %v416_v0  ;;  %419 = vmatpush.bf16.msra.mxu2 %v416_v0  ;;  %v415_v2 = vld [vmem:[#allocation6] sm:$0xff]  ;;  %v417_v3 = vld [vmem:[#allocation8] sm:$0xff]  ;;  %v414_v5 = vld [vmem:[#allocation3 + $0x8] sm:$0xff]  ;;  %vm230_vm2 = vcmask 1041409   ;;  %vm233_vm3 = vcmask 123904   ;;  %v577_v58 = vmov 0  }
  0x11   :  { %165 = vmatpush.bf16.msra.mxu1 %v418_v1  ;;  %v413_v4 = vld [vmem:[#allocation3] sm:$0xff]  ;;  %v650_v41 = vand.u32 127, %v220_v39  ;;  %431 = vset.pattern.permute.xlu1 %v577_v58  ;;  %s578_s6 = smov [#allocation10]   ;;  %s370_s27 = sshll.u32 %s701_s8, 4  ;;  %vm341_vm4 = vcmask 254976   ;;  %s371_s27 = int_to_ptr.hbm [resolvable:$true] %s370_s27 }
  0x12   :  { %v83_v6 = vld [vmem:[%s694_s1] sm:$0x1]  ;;  %430 = vset.pattern.permute.xlu0 %v577_v58  ;;  %429 = vset.pattern.permute.xlu2 %v577_v58  ;;  %s368_s24 = sshll.u32 %s578_s6, 4  ;;  %s579_s8 = smov [#allocation9]   ;;  %s369_s24 = int_to_ptr.vmem [resolvable:$true] %s368_s24 }
  0x13   :  { %v432_v11 = vld [vmem:[%s697_s4] ss:$0 sm:$0xff]  ;;  %v656_v43 = vadd.s32 4294967288, %v650_v41  ;;  %s357_s28 = sshll.u32 %s579_s8, 4  ;;  %s359_s9 = sshll.u32 %s700_s7, 4  ;;  %s358_s28 = int_to_ptr.vmem [resolvable:$true] %s357_s28  ;;  %s360_s9 = int_to_ptr.hbm [resolvable:$true] %s359_s9 }
  0x14   :  { %132 = vmatpush.bf16.msra.mxu0 %v415_v2  ;;  %420 = vmatpush.bf16.msra.mxu2 %v415_v2  ;;  %v433_v16 = vld [vmem:[%s698_s5] ss:$0 sm:$0xff] }
  0x15   :  { %166 = vmatpush.bf16.msra.mxu1 %v417_v3 }
  0x17   :  { %402 = vmatmul.msk.bf16.vlgmr.msra.gmra.mxu0 %vm118_vm0, %v413_v4  ;;  %403 = vmatmul.msk.bf16.vlgmr.msra.gmra.mxu2 %vm118_vm0, %v414_v5 }
  0x18   :  { %412 = vmatmul.msk.bf16.vlgmr.msra.gmra.mxu1 %vm118_vm0, %v83_v6 }
  0x94   :  { %v134_v7 = vpop.f32.mrf.mxu0 }
  0x95   :  { %v168_v8 = vpop.f32.mrf.mxu1 }
  0x96   :  { %v173_v9 = vrot.slane %v168_v8, 1  ;;  %v174_v10 = vperm.slane %v168_v8, 0 }
  0x98   :  { %v175_v12 = vperm.slane %v173_v9, 0  ;;  %v178_v13 = vadd.f32 %v174_v10, %v134_v7 }
  0x9a   :  { %v139_v14 = vpop.f32.mrf.mxu2  ;;  %v185_v15 = vadd.f32 %v432_v11, %v178_v13 }
  0x9b   :  { %v180_v17 = vadd.f32 %v175_v12, %v139_v14 }
  0x9c   :  { %v136_v18 = vpop.f32.mrf.mxu0  ;;  %v189_v19 = vmax.f32 %v185_v15, 0.0 }
  0x9d   :  { %v187_v20 = vadd.f32 %v432_v11, %v180_v17  ;;  %v179_v21 = vadd.f32 %v174_v10, %v136_v18  ;;  %v170_v22 = vpop.f32.mrf.mxu1 }
  0x9e   :  { %v196_v23 = vmul.f32 %v433_v16, %v189_v19 }
  0x9f   :  { %v191_v24 = vmax.f32 %v187_v20, 0.0  ;;  %v186_v25 = vadd.f32 %v432_v11, %v179_v21 }
  0xa0   :  { %v200_v26 = vsel %vm118_vm0, %v196_v23, 0.0 }
  0xa1   :  { %v190_v27 = vmax.f32 %v186_v25, 0.0  ;;  %201 = vadd.xlane.f32.xlu0 %v200_v26  ;;  %v198_v28 = vmul.f32 %v433_v16, %v191_v24 }
  0xa2   :  { %v141_v29 = vpop.f32.mrf.mxu2 }
  0xa3   :  { %v181_v30 = vadd.f32 %v175_v12, %v141_v29  ;;  %v206_v31 = vsel %vm118_vm0, %v198_v28, 0.0  ;;  %v197_v32 = vmul.f32 %v433_v16, %v190_v27 }
  0xa4   :  { %207 = vadd.xlane.f32.xlu1 %v206_v31  ;;  %v79_v31 = vld [vmem:[#allocation3] sm:$0xff]  }
  0xa5   :  { %v188_v33 = vadd.f32 %v432_v11, %v181_v30  ;;  %v203_v35 = vsel %vm118_vm0, %v197_v32, 0.0  ;;  %v291_v32 = vunpack.c.l.bf16 %v79_v31 }
  0xa7   :  { %v192_v34 = vmax.f32 %v188_v33, 0.0  ;;  %v292_v33 = vunpack.c.h.bf16 %v79_v31 }
  0xa9   :  { %204 = vadd.xlane.f32.xlu0 %v203_v35  ;;  %v199_v36 = vmul.f32 %v433_v16, %v192_v34  ;;  %v81_v35 = vld [vmem:[#allocation3 + $0x8] sm:$0xff]  }
  0xab   :  { %v209_v37 = vsel %vm118_vm0, %v199_v36, 0.0 }
  0xac   :  { %210 = vadd.xlane.f32.xlu1 %v209_v37 }
 0x114   :  { %v202_v38 = vpop.xlane.xlu0 %201 }
 0x115   :  { %v212_v46 = vadd.f32 %v202_v38, %v85_v42  ;;  %v293_v38 = vunpack.c.l.bf16 %v81_v35 }
 0x117   :  { %v208_v40 = vpop.xlane.xlu1 %207  ;;  %v222_v51 = vperm.slane %v212_v46, %v650_v41 }
 0x118   :  { %v214_v47 = vadd.f32 %v208_v40, %v85_v42 }
 0x11a   :  { %v227_v52 = vperm.slane %v214_v47, %v650_v41 }
 0x11c   :  { %v205_v44 = vpop.xlane.xlu0 %204 }
 0x11d   :  { %v213_v45 = vadd.f32 %v205_v44, %v85_v42 }
 0x11f   :  { %v211_v48 = vpop.xlane.xlu1 %210  ;;  %v224_v49 = vperm.slane %v213_v45, %v656_v43 }
 0x120   :  { %v215_v50 = vadd.f32 %v211_v48, %v85_v42 }
 0x121   :  { %v226_v54 = vsel %vm225_vm1, %v224_v49, %v222_v51 }
 0x122   :  { %v228_v53 = vperm.slane %v215_v50, %v656_v43 }
 0x124   :  { %v229_v55 = vsel %vm225_vm1, %v228_v53, %v227_v52 }
 0x125   :  { %v231_v56 = vsel %vm230_vm2, %v229_v55, %v226_v54 }
 0x126   :  { %v234_v57 = vsel %vm233_vm3, %v231_v56, -inf }
 0x127   :  { %235 = vmax.xlane.f32.xlu2 %v234_v57 }
 0x19a   :  { %v236_v59 = vpop.xlane.xlu2 %235 }
 0x19b   :  { %v238_v60 = vperm.slane %v236_v59, 0  ;;  %v239_v61 = vperm.slane %v236_v59, 1 }
 0x19d   :  { %v242_v62 = vsub.f32 %v212_v46, %v238_v60  ;;  %v243_v63 = vsub.f32 %v213_v45, %v238_v60  ;;  %v244_v0 = vsub.f32 %v214_v47, %v239_v61  ;;  %v245_v4 = vsub.f32 %v215_v50, %v239_v61 }
 0x19e   :  { %v294_v45 = vunpack.c.h.bf16 %v81_v35 }
 0x19f   :  { %v246_v1 = vmul.f32 1.442695, %v242_v62  ;;  %v248_v2 = vmul.f32 1.442695, %v243_v63  ;;  %v250_v3 = vmul.f32 1.442695, %v244_v0 }
 0x1a0   :  { %v252_v5 = vmul.f32 1.442695, %v245_v4 }
 0x1a1   :  { %434 = vpow2.f32 %v246_v1 }
 0x1a2   :  { %436 = vpow2.f32 %v248_v2 }
 0x1a3   :  { %438 = vpow2.f32 %v250_v3 }
 0x1a4   :  { %440 = vpow2.f32 %v252_v5 }
 0x1a7   :  { %v435_v6 = vpop.eup %434 }
 0x1a8   :  { %v437_v7 = vpop.eup %436  ;;  %259 = vperm.xlu2 %429, %v435_v6  }
 0x1a9   :  { %v439_v8 = vpop.eup %438  ;;  %262 = vperm.xlu0 %430, %v437_v7  }
 0x1aa   :  { %265 = vperm.xlu1 %431, %v439_v8   ;;  %v441_v9 = vpop.eup %440 }
 0x1b0   :  { %268 = vperm.xlu2 %429, %v441_v9  }
 0x202   :  { %v260_v10 = vpop.permute.xlu2 %259 }
 0x203   :  { %v270_v13 = vperm.slane %v260_v10, %v650_v41 }
 0x20a   :  { %v269_v11 = vpop.permute.xlu2 %268 }
 0x20b   :  { %v274_v16 = vperm.slane %v269_v11, %v656_v43 }
 0x21b   :  { %v263_v12 = vpop.permute.xlu0 %262 }
 0x21c   :  { %v266_v14 = vpop.permute.xlu1 %265  ;;  %v271_v15 = vperm.slane %v263_v12, %v656_v43 }
 0x21d   :  { %v273_v17 = vperm.slane %v266_v14, %v650_v41 }
 0x21e   :  { %v272_v18 = vsel %vm225_vm1, %v271_v15, %v270_v13 }
 0x21f   :  { %v275_v19 = vsel %vm225_vm1, %v274_v16, %v273_v17 }
 0x220   :  { %v276_v20 = vsel %vm230_vm2, %v275_v19, %v272_v18 }
 0x221   :  { %v278_v21 = vsel %vm233_vm3, %v276_v20, 0.0 }
 0x222   :  { %279 = vadd.xlane.f32.xlu2 %v278_v21 }
 0x295   :  { %v280_v22 = vpop.xlane.xlu2 %279 }
 0x296   :  { %442 = vrcp.f32 %v280_v22 }
 0x29c   :  { %v443_v23 = vpop.eup %442 }
 0x29d   :  { %v284_v24 = vperm.slane %v443_v23, 1  ;;  %v283_v25 = vperm.slane %v443_v23, 0 }
 0x29f   :  { %v289_v26 = vmul.f32 %v439_v8, %v284_v24  ;;  %v287_v27 = vmul.f32 %v435_v6, %v283_v25  ;;  %v288_v28 = vmul.f32 %v437_v7, %v283_v25  ;;  %v290_v29 = vmul.f32 %v441_v9, %v284_v24 }
 0x2a1   :  { %307 = vperm.xlu0 %430, %v289_v26   ;;  %297 = vperm.xlu1 %431, %v287_v27  }
 0x2a9   :  { %302 = vperm.xlu1 %431, %v288_v28  }
 0x2b1   :  { %312 = vperm.xlu1 %431, %v290_v29  }
 0x313   :  { %v298_v30 = vpop.permute.xlu1 %297  ;;  %v308_v42 = vpop.permute.xlu0 %307 }
 0x314   :  { %v315_v34 = vmul.f32 %v298_v30, %v291_v32  ;;  %v317_v47 = vmul.f32 %v308_v42, %v293_v38  ;;  %v346_v51 = vperm.slane %v308_v42, %v650_v41  ;;  %v343_v52 = vperm.slane %v298_v30, %v650_v41 }
 0x316   :  { %v319_v39 = vsel %vm118_vm0, %v315_v34, 0.0  ;;  %v328_v55 = vsel %vm118_vm0, %v317_v47, 0.0 }
 0x31b   :  { %v303_v36 = vpop.permute.xlu1 %302 }
 0x31c   :  { %v316_v37 = vmul.f32 %v303_v36, %v292_v33  ;;  %v344_v48 = vperm.slane %v303_v36, %v656_v43 }
 0x31e   :  { %v320_v40 = vsel %vm118_vm0, %v316_v37, 0.0  ;;  %v345_v56 = vsel %vm225_vm1, %v344_v48, %v343_v52 }
 0x31f   :  { %v321_v44 = vadd.f32 %v320_v40, %v319_v39 }
 0x321   :  { %v322_v46 = vrot.slane %v321_v44, 4 }
 0x323   :  { %v323_v49 = vadd.f32 %v322_v46, %v321_v44  ;;  %v313_v50 = vpop.permute.xlu1 %312 }
 0x324   :  { %v318_v53 = vmul.f32 %v313_v50, %v294_v45  ;;  %v347_v54 = vperm.slane %v313_v50, %v656_v43 }
 0x325   :  { %v324_v59 = vrot.slane %v323_v49, 2 }
 0x326   :  { %v329_v57 = vsel %vm118_vm0, %v318_v53, 0.0  ;;  %v348_v58 = vsel %vm225_vm1, %v347_v54, %v346_v51 }
 0x327   :  { %v330_v60 = vadd.f32 %v329_v57, %v328_v55  ;;  %v349_v61 = vsel %vm230_vm2, %v348_v58, %v345_v56  ;;  %v325_v62 = vadd.f32 %v324_v59, %v323_v49 }
 0x328   :  { %351 = vst.msk [vmem:[#allocation10] sm:$0x3] %vm233_vm3, %v349_v61 }
 0x329   :  { %v331_v41 = vrot.slane %v330_v60, 4  ;;  %373 = dma.vmem_to_hbm [thread:$0]  %s369_s24, 32, %s371_s27, [#allocation11]   ;;  %v326_v0 = vrot.slane %v325_v62, 1 }
 0x32b   :  { %v332_v43 = vadd.f32 %v331_v41, %v330_v60  ;;  %v327_v4 = vadd.f32 %v326_v0, %v325_v62 }
 0x32d   :  { %v333_v63 = vrot.slane %v332_v43, 2 }
 0x32f   :  { %v334_v1 = vadd.f32 %v333_v63, %v332_v43 }
 0x331   :  { %v335_v2 = vrot.slane %v334_v1, 1 }
 0x333   :  { %v336_v3 = vadd.f32 %v335_v2, %v334_v1 }
 0x335   :  { %v339_v5 = vsel %vm230_vm2, %v336_v3, %v327_v4 }
 0x336   :  { %342 = vst.msk [vmem:[#allocation9] sm:$0x3] %vm341_vm4, %v339_v5 }
 0x337   :  { %362 = dma.vmem_to_hbm [thread:$0]  %s358_s28, 32, %s360_s9, [#allocation5]  }
 0x338   :  { %568 = dma.done.wait [#allocation5], 32  }
 0x339   :  { %569 = vsyncadd [#allocation5], 4294967264 }
 0x33a   :  { %570 = dma.done.wait [#allocation11], 32  }
 0x33b   :  { %571 = vsyncadd [#allocation11], 4294967264 }
 0x33c   :  { %382 = vsyncpa [#allocation4], 1 }
 0x33d   :  { %383 = vsyncpa [#allocation7], 1 }
 0x33e   :  { %384 = vsyncpa [#allocation5], 1 }
 0x33f   :  { %385 = vsyncpa [#allocation11], 1 }

// kernel: tpu_custom_call.1
= control target key start
LH: loop header
LB: loop body
LE: loop exit
PB: predicated region body
PF: predicated region fallthrough
CT: control target
= control target key end

     0   :  { %15 = vsyncpa [#allocation4], 0  ;;  %s693_s0 = inlined_call_operand.hbm [shape: bf16[2,16,32], index: 0, kind: input, shape index: {}]   ;;  %s694_s1 = inlined_call_operand.vmem [shape: bf16[2,32], index: 1, kind: input, shape index: {}]   ;;  %s695_s2 = inlined_call_operand.hbm [shape: bf16[32,32], index: 2, kind: input, shape index: {}]   ;;  %s696_s3 = inlined_call_operand.hbm [shape: bf16[32,32], index: 3, kind: input, shape index: {}]   ;;  %s697_s4 = inlined_call_operand.vmem [shape: f32[1,32], index: 4, kind: input, shape index: {}]   ;;  %s698_s5 = inlined_call_operand.vmem [shape: f32[1,32], index: 5, kind: input, shape index: {}]   ;;  %s699_s6 = inlined_call_operand.<no memory space> [shape: f32[1], index: 6, kind: input, shape index: {}]   ;;  %s700_s7 = inlined_call_operand.hbm [shape: f32[2,32], index: 7, kind: output, shape index: {0}]   ;;  %s701_s8 = inlined_call_operand.hbm [shape: f32[2,16], index: 8, kind: output, shape index: {1}]  }
   0x1   :  { %16 = vsyncpa [#allocation7], 0 }
   0x2   :  { %17 = vsyncpa [#allocation5], 0 }
   0x3   :  { %18 = vsyncpa [#allocation11], 0  ;;  %s38_s29 = sshll.u32 %s695_s2, 4  ;;  %s572_s30 = smov [#allocation6]   ;;  %s39_s29 = int_to_ptr.hbm [resolvable:$true] %s38_s29 }
   0x4   :  { %s40_s9 = sshll.u32 %s572_s30, 4  ;;  %s23_s12 = sshll.u32 %s693_s0, 4  ;;  %s41_s9 = int_to_ptr.vmem [resolvable:$true] %s40_s9  ;;  %s24_s12 = int_to_ptr.hbm [resolvable:$true] %s23_s12 }
   0x5   :  { %s573_s13 = smov 64   ;;  %s574_s14 = smov 4  }
   0x6   :  { %46 = dma.hbm_to_vmem [thread:$0]  %s39_s29, 256, %s41_s9, [#allocation7], %s573_s13, %s573_s13, %s574_s14  }
   0x7   :  { %s575_s15 = smov [#allocation3]   ;;  %s51_s19 = sshll.u32 %s696_s3, 4  ;;  %s52_s19 = int_to_ptr.hbm [resolvable:$true] %s51_s19 }
   0x8   :  { %s25_s16 = sshll.u32 %s575_s15, 4  ;;  %s576_s2 = smov [#allocation8]   ;;  %s26_s16 = int_to_ptr.vmem [resolvable:$true] %s25_s16 }
   0x9   :  { %31 = dma.hbm_to_vmem [thread:$0]  %s24_s12, 256, %s26_s16, [#allocation4], %s573_s13, %s573_s13, %s574_s14  }
   0xa   :  { %s53_s20 = sshll.u32 %s576_s2, 4  ;;  %s54_s20 = int_to_ptr.vmem [resolvable:$true] %s53_s20 }
   0xb   :  { %59 = dma.hbm_to_vmem [thread:$0]  %s52_s19, 256, %s54_s20, [#allocation7], %s573_s13, %s573_s13, %s574_s14  }
   0xc   :  { %564 = dma.done.wait [#allocation4], 256  }
   0xd   :  { %565 = vsyncadd [#allocation4], 4294967040 }
   0xe   :  { %566 = dma.done.wait [#allocation7], 512  }
   0xf   :  { %567 = vsyncadd [#allocation7], 4294966784  ;;  %v416_v0 = vld [vmem:[#allocation6 + $0x8] sm:$0xff]  ;;  %v418_v1 = vld [vmem:[#allocation8 + $0x8] sm:$0xff]  ;;  %vm118_vm0 = vcmask 261120   ;;  %v220_v39 = vlaneseq  ;;  %v85_v42 = vstv %s699_s6  ;;  %vm225_vm1 = vcmask 130112  }
  0x10   :  { %131 = vmatpush.bf16.msra.mxu0 %v416_v0  ;;  %419 = vmatpush.bf16.msra.mxu2 %v416_v0  ;;  %v415_v2 = vld [vmem:[#allocation6] sm:$0xff]  ;;  %v417_v3 = vld [vmem:[#allocation8] sm:$0xff]  ;;  %v414_v5 = vld [vmem:[#allocation3 + $0x8] sm:$0xff]  ;;  %vm230_vm2 = vcmask 1041409   ;;  %vm233_vm3 = vcmask 123904   ;;  %v577_v58 = vmov 0  }
  0x11   :  { %165 = vmatpush.bf16.msra.mxu1 %v418_v1  ;;  %v413_v4 = vld [vmem:[#allocation3] sm:$0xff]  ;;  %v650_v41 = vand.u32 127, %v220_v39  ;;  %431 = vset.pattern.permute.xlu1 %v577_v58  ;;  %s578_s6 = smov [#allocation10]   ;;  %s370_s27 = sshll.u32 %s701_s8, 4  ;;  %vm341_vm4 = vcmask 254976   ;;  %s371_s27 = int_to_ptr.hbm [resolvable:$true] %s370_s27 }
  0x12   :  { %v83_v6 = vld [vmem:[%s694_s1] sm:$0x1]  ;;  %430 = vset.pattern.permute.xlu0 %v577_v58  ;;  %429 = vset.pattern.permute.xlu2 %v577_v58  ;;  %s368_s24 = sshll.u32 %s578_s6, 4  ;;  %s579_s8 = smov [#allocation9]   ;;  %s369_s24 = int_to_ptr.vmem [resolvable:$true] %s368_s24 }
  0x13   :  { %v432_v11 = vld [vmem:[%s697_s4] ss:$0 sm:$0xff]  ;;  %v656_v43 = vadd.s32 4294967288, %v650_v41  ;;  %s357_s28 = sshll.u32 %s579_s8, 4  ;;  %s359_s9 = sshll.u32 %s700_s7, 4  ;;  %s358_s28 = int_to_ptr.vmem [resolvable:$true] %s357_s28  ;;  %s360_s9 = int_to_ptr.hbm [resolvable:$true] %s359_s9 }
  0x14   :  { %132 = vmatpush.bf16.msra.mxu0 %v415_v2  ;;  %420 = vmatpush.bf16.msra.mxu2 %v415_v2  ;;  %v433_v16 = vld [vmem:[%s698_s5] ss:$0 sm:$0xff] }
  0x15   :  { %166 = vmatpush.bf16.msra.mxu1 %v417_v3 }
  0x17   :  { %402 = vmatmul.msk.bf16.vlgmr.msra.gmra.mxu0 %vm118_vm0, %v413_v4  ;;  %403 = vmatmul.msk.bf16.vlgmr.msra.gmra.mxu2 %vm118_vm0, %v414_v5 }
  0x18   :  { %412 = vmatmul.msk.bf16.vlgmr.msra.gmra.mxu1 %vm118_vm0, %v83_v6 }
  0x94   :  { %v134_v7 = vpop.f32.mrf.mxu0 }
  0x95   :  { %v168_v8 = vpop.f32.mrf.mxu1 }
  0x96   :  { %v173_v9 = vrot.slane %v168_v8, 1  ;;  %v174_v10 = vperm.slane %v168_v8, 0 }
  0x98   :  { %v175_v12 = vperm.slane %v173_v9, 0  ;;  %v178_v13 = vadd.f32 %v174_v10, %v134_v7 }
  0x9a   :  { %v139_v14 = vpop.f32.mrf.mxu2  ;;  %v185_v15 = vadd.f32 %v432_v11, %v178_v13 }
  0x9b   :  { %v180_v17 = vadd.f32 %v175_v12, %v139_v14 }
  0x9c   :  { %v136_v18 = vpop.f32.mrf.mxu0  ;;  %v189_v19 = vmax.f32 %v185_v15, 0.0 }
  0x9d   :  { %v187_v20 = vadd.f32 %v432_v11, %v180_v17  ;;  %v179_v21 = vadd.f32 %v174_v10, %v136_v18  ;;  %v170_v22 = vpop.f32.mrf.mxu1 }
  0x9e   :  { %v196_v23 = vmul.f32 %v433_v16, %v189_v19 }
  0x9f   :  { %v191_v24 = vmax.f32 %v187_v20, 0.0  ;;  %v186_v25 = vadd.f32 %v432_v11, %v179_v21 }
  0xa0   :  { %v200_v26 = vsel %vm118_vm0, %v196_v23, 0.0 }
  0xa1   :  { %v190_v27 = vmax.f32 %v186_v25, 0.0  ;;  %201 = vadd.xlane.f32.xlu0 %v200_v26  ;;  %v198_v28 = vmul.f32 %v433_v16, %v191_v24 }
  0xa2   :  { %v141_v29 = vpop.f32.mrf.mxu2 }
  0xa3   :  { %v181_v30 = vadd.f32 %v175_v12, %v141_v29  ;;  %v206_v31 = vsel %vm118_vm0, %v198_v28, 0.0  ;;  %v197_v32 = vmul.f32 %v433_v16, %v190_v27 }
  0xa4   :  { %207 = vadd.xlane.f32.xlu1 %v206_v31  ;;  %v79_v31 = vld [vmem:[#allocation3] sm:$0xff]  }
  0xa5   :  { %v188_v33 = vadd.f32 %v432_v11, %v181_v30  ;;  %v203_v35 = vsel %vm118_vm0, %v197_v32, 0.0  ;;  %v291_v32 = vunpack.c.l.bf16 %v79_v31 }
  0xa7   :  { %v192_v34 = vmax.f32 %v188_v33, 0.0  ;;  %v292_v33 = vunpack.c.h.bf16 %v79_v31 }
  0xa9   :  { %204 = vadd.xlane.f32.xlu0 %v203_v35  ;;  %v199_v36 = vmul.f32 %v433_v16, %v192_v34  ;;  %v81_v35 = vld [vmem:[#allocation3 + $0x8] sm:$0xff]  }
  0xab   :  { %v209_v37 = vsel %vm118_vm0, %v199_v36, 0.0 }
  0xac   :  { %210 = vadd.xlane.f32.xlu1 %v209_v37 }
 0x114   :  { %v202_v38 = vpop.xlane.xlu0 %201 }
 0x115   :  { %v212_v46 = vadd.f32 %v202_v38, %v85_v42  ;;  %v293_v38 = vunpack.c.l.bf16 %v81_v35 }
 0x117   :  { %v208_v40 = vpop.xlane.xlu1 %207  ;;  %v222_v51 = vperm.slane %v212_v46, %v650_v41 }
 0x118   :  { %v214_v47 = vadd.f32 %v208_v40, %v85_v42 }
 0x11a   :  { %v227_v52 = vperm.slane %v214_v47, %v650_v41 }
 0x11c   :  { %v205_v44 = vpop.xlane.xlu0 %204 }
 0x11d   :  { %v213_v45 = vadd.f32 %v205_v44, %v85_v42 }
 0x11f   :  { %v211_v48 = vpop.xlane.xlu1 %210  ;;  %v224_v49 = vperm.slane %v213_v45, %v656_v43 }
 0x120   :  { %v215_v50 = vadd.f32 %v211_v48, %v85_v42 }
 0x121   :  { %v226_v54 = vsel %vm225_vm1, %v224_v49, %v222_v51 }
 0x122   :  { %v228_v53 = vperm.slane %v215_v50, %v656_v43 }
 0x124   :  { %v229_v55 = vsel %vm225_vm1, %v228_v53, %v227_v52 }
 0x125   :  { %v231_v56 = vsel %vm230_vm2, %v229_v55, %v226_v54 }
 0x126   :  { %v234_v57 = vsel %vm233_vm3, %v231_v56, -inf }
 0x127   :  { %235 = vmax.xlane.f32.xlu2 %v234_v57 }
 0x19a   :  { %v236_v59 = vpop.xlane.xlu2 %235 }
 0x19b   :  { %v238_v60 = vperm.slane %v236_v59, 0  ;;  %v239_v61 = vperm.slane %v236_v59, 1 }
 0x19d   :  { %v242_v62 = vsub.f32 %v212_v46, %v238_v60  ;;  %v243_v63 = vsub.f32 %v213_v45, %v238_v60  ;;  %v244_v0 = vsub.f32 %v214_v47, %v239_v61  ;;  %v245_v4 = vsub.f32 %v215_v50, %v239_v61 }
 0x19e   :  { %v294_v45 = vunpack.c.h.bf16 %v81_v35 }
 0x19f   :  { %v246_v1 = vmul.f32 1.442695, %v242_v62  ;;  %v248_v2 = vmul.f32 1.442695, %v243_v63  ;;  %v250_v3 = vmul.f32 1.442695, %v244_v0 }
 0x1a0   :  { %v252_v5 = vmul.f32 1.442695, %v245_v4 }
 0x1a1   :  { %434 = vpow2.f32 %v246_v1 }
 0x1a2   :  { %436 = vpow2.f32 %v248_v2 }
 0x1a3   :  { %438 = vpow2.f32 %v250_v3 }
 0x1a4   :  { %440 = vpow2.f32 %v252_v5 }
 0x1a7   :  { %v435_v6 = vpop.eup %434 }
 0x1a8   :  { %v437_v7 = vpop.eup %436  ;;  %259 = vperm.xlu2 %429, %v435_v6  }
 0x1a9   :  { %v439_v8 = vpop.eup %438  ;;  %262 = vperm.xlu0 %430, %v437_v7  }
 0x1aa   :  { %265 = vperm.xlu1 %431, %v439_v8   ;;  %v441_v9 = vpop.eup %440 }
 0x1b0   :  { %268 = vperm.xlu2 %429, %v441_v9  }
 0x202   :  { %v260_v10 = vpop.permute.xlu2 %259 }
 0x203   :  { %v270_v13 = vperm.slane %v260_v10, %v650_v41 }
 0x20a   :  { %v269_v11 = vpop.permute.xlu2 %268 }
 0x20b   :  { %v274_v16 = vperm.slane %v269_v11, %v656_v43 }
 0x21b   :  { %v263_v12 = vpop.permute.xlu0 %262 }
 0x21c   :  { %v266_v14 = vpop.permute.xlu1 %265  ;;  %v271_v15 = vperm.slane %v263_v12, %v656_v43 }
 0x21d   :  { %v273_v17 = vperm.slane %v266_v14, %v650_v41 }
 0x21e   :  { %v272_v18 = vsel %vm225_vm1, %v271_v15, %v270_v13 }
 0x21f   :  { %v275_v19 = vsel %vm225_vm1, %v274_v16, %v273_v17 }
 0x220   :  { %v276_v20 = vsel %vm230_vm2, %v275_v19, %v272_v18 }
 0x221   :  { %v278_v21 = vsel %vm233_vm3, %v276_v20, 0.0 }
 0x222   :  { %279 = vadd.xlane.f32.xlu2 %v278_v21 }
 0x295   :  { %v280_v22 = vpop.xlane.xlu2 %279 }
 0x296   :  { %442 = vrcp.f32 %v280_v22 }
 0x29c   :  { %v443_v23 = vpop.eup %442 }
 0x29d   :  { %v284_v24 = vperm.slane %v443_v23, 1  ;;  %v283_v25 = vperm.slane %v443_v23, 0 }
 0x29f   :  { %v289_v26 = vmul.f32 %v439_v8, %v284_v24  ;;  %v287_v27 = vmul.f32 %v435_v6, %v283_v25  ;;  %v288_v28 = vmul.f32 %v437_v7, %v283_v25  ;;  %v290_v29 = vmul.f32 %v441_v9, %v284_v24 }
 0x2a1   :  { %307 = vperm.xlu0 %430, %v289_v26   ;;  %297 = vperm.xlu1 %431, %v287_v27  }
 0x2a9   :  { %302 = vperm.xlu1 %431, %v288_v28  }
 0x2b1   :  { %312 = vperm.xlu1 %431, %v290_v29  }
 0x313   :  { %v298_v30 = vpop.permute.xlu1 %297  ;;  %v308_v42 = vpop.permute.xlu0 %307 }
 0x314   :  { %v315_v34 = vmul.f32 %v298_v30, %v291_v32  ;;  %v317_v47 = vmul.f32 %v308_v42, %v293_v38  ;;  %v346_v51 = vperm.slane %v308_v42, %v650_v41  ;;  %v343_v52 = vperm.slane %v298_v30, %v650_v41 }
 0x316   :  { %v319_v39 = vsel %vm118_vm0, %v315_v34, 0.0  ;;  %v328_v55 = vsel %vm118_vm0, %v317_v47, 0.0 }
 0x31b   :  { %v303_v36 = vpop.permute.xlu1 %302 }
 0x31c   :  { %v316_v37 = vmul.f32 %v303_v36, %v292_v33  ;;  %v344_v48 = vperm.slane %v303_v36, %v656_v43 }
 0x31e   :  { %v320_v40 = vsel %vm118_vm0, %v316_v37, 0.0  ;;  %v345_v56 = vsel %vm225_vm1, %v344_v48, %v343_v52 }
 0x31f   :  { %v321_v44 = vadd.f32 %v320_v40, %v319_v39 }
 0x321   :  { %v322_v46 = vrot.slane %v321_v44, 4 }
 0x323   :  { %v323_v49 = vadd.f32 %v322_v46, %v321_v44  ;;  %v313_v50 = vpop.permute.xlu1 %312 }
 0x324   :  { %v318_v53 = vmul.f32 %v313_v50, %v294_v45  ;;  %v347_v54 = vperm.slane %v313_v50, %v656_v43 }
 0x325   :  { %v324_v59 = vrot.slane %v323_v49, 2 }
 0x326   :  { %v329_v57 = vsel %vm118_vm0, %v318_v53, 0.0  ;;  %v348_v58 = vsel %vm225_vm1, %v347_v54, %v346_v51 }
 0x327   :  { %v330_v60 = vadd.f32 %v329_v57, %v328_v55  ;;  %v349_v61 = vsel %vm230_vm2, %v348_v58, %v345_v56  ;;  %v325_v62 = vadd.f32 %v324_v59, %v323_v49 }
 0x328   :  { %351 = vst.msk [vmem:[#allocation10] sm:$0x3] %vm233_vm3, %v349_v61 }
 0x329   :  { %v331_v41 = vrot.slane %v330_v60, 4  ;;  %373 = dma.vmem_to_hbm [thread:$0]  %s369_s24, 32, %s371_s27, [#allocation11]   ;;  %v326_v0 = vrot.slane %v325_v62, 1 }
 0x32b   :  { %v332_v43 = vadd.f32 %v331_v41, %v330_v60  ;;  %v327_v4 = vadd.f32 %v326_v0, %v325_v62 }
 0x32d   :  { %v333_v63 = vrot.slane %v332_v43, 2 }
 0x32f   :  { %v334_v1 = vadd.f32 %v333_v63, %v332_v43 }
 0x331   :  { %v335_v2 = vrot.slane %v334_v1, 1 }
 0x333   :  { %v336_v3 = vadd.f32 %v335_v2, %v334_v1 }
 0x335   :  { %v339_v5 = vsel %vm230_vm2, %v336_v3, %v327_v4 }
 0x336   :  { %342 = vst.msk [vmem:[#allocation9] sm:$0x3] %vm341_vm4, %v339_v5 }
 0x337   :  { %362 = dma.vmem_to_hbm [thread:$0]  %s358_s28, 32, %s360_s9, [#allocation5]  }
 0x338   :  { %568 = dma.done.wait [#allocation5], 32  }
 0x339   :  { %569 = vsyncadd [#allocation5], 4294967264 }
 0x33a   :  { %570 = dma.done.wait [#allocation11], 32  }
 0x33b   :  { %571 = vsyncadd [#allocation11], 4294967264 }
 0x33c   :  { %382 = vsyncpa [#allocation4], 1 }
 0x33d   :  { %383 = vsyncpa [#allocation7], 1 }
 0x33e   :  { %384 = vsyncpa [#allocation5], 1 }
 0x33f   :  { %385 = vsyncpa [#allocation11], 1 }

</bundles_post_ra>
